<compile_context>
chip_gen: v7x
topology: tpu7x:2x2x1
jax: 0.10.0
libtpu: 0.0.40
codegen_flags: <defaults>
</compile_context>

<pallas_src>
import functools

import jax
import jax.numpy as jnp
import numpy as np
from jax.experimental import pallas as pl
from jax.experimental.pallas import tpu as pltpu


def _conv3x3_s2_kernel(x_ref, w_ref, b_ref, o_ref, *, ho, wo, relu_input,
                       compute_dtype):
    """One grid step: nb images x (all spatial) x one Cout chunk.

    x_ref: (nb, 2, Hh, Wo, 3*Cin)  row-phase (even/odd padded rows) major, the
                                   3 kw column taps pre-gathered into lanes.
    w_ref: (9*Cin, CB)             K ordered as (kh, kw, cin).
    b_ref: (1, CB)
    o_ref: (nb, Ho*Wo, CB)
    """
    nb = x_ref.shape[0]
    k3 = x_ref.shape[-1]                      # 3 * Cin
    cb = o_ref.shape[-1]

    x = x_ref[...]
    if relu_input:
        # Hoisted ReLU: once per element (commutes with the zero padding and
        # the column gather since relu(0) == 0).
        x = jnp.maximum(x, 0)
    x = x.astype(compute_dtype)

    # Row taps kh=0,1,2 -> (row phase kh % 2, half-row offset kh // 2).
    # These slice only the third-from-minor axis (no sublane/lane shifts).
    taps = [x[:, kh % 2, kh // 2:kh // 2 + ho, :, :] for kh in range(3)]
    # im2col patch: concat along lanes -> K = 9*Cin, one MXU matmul.
    patch = jnp.concatenate(taps, axis=-1).reshape(nb * ho * wo, 3 * k3)

    acc = jnp.dot(patch, w_ref[...].astype(compute_dtype),
                  preferred_element_type=jnp.float32)
    acc = acc + b_ref[...].astype(jnp.float32)
    o_ref[...] = acc.reshape(nb, ho * wo, cb).astype(o_ref.dtype)


def conv3x3_s2_p1(x_nhwc, w_hwio, b, *, relu_input=False, compute_dtype=None):
    """3x3 / stride-2 / pad-1 conv (optionally ReLU on the input), NHWC."""
    N, H, W, Cin = x_nhwc.shape
    Cout = w_hwio.shape[-1]
    if compute_dtype is None:
        compute_dtype = x_nhwc.dtype

    Ho = (H - 1) // 2 + 1
    Wo = (W - 1) // 2 + 1
    Hh = Ho + 1                               # half-rows per row phase

    # Zero padding: 1 on top/left (as in the conv); bottom/right just enough so
    # every gathered element exists.
    pad_b = 2 * Ho + 1 - H
    pad_r = 2 * Wo - W
    xp = jnp.pad(x_nhwc, ((0, 0), (1, pad_b), (1, pad_r), (0, 0)))

    # Host-side column gather: one plane per kw tap (stride-2 columns starting
    # at kw), merged into the lane axis -> all in-kernel W accesses start at 0
    # (removes the sublane-offset relayout copies flagged in review).
    cols = jnp.stack([xp[:, :, k:k + 2 * Wo:2, :] for k in range(3)], axis=3)
    cols = cols.reshape(N, 2 * Hh, Wo, 3 * Cin)
    # Row-phase split (even / odd padded rows): (N, 2, Hh, Wo, 3*Cin).
    xarr = jnp.stack([cols[:, 0::2], cols[:, 1::2]], axis=1)

    w2 = w_hwio.reshape(9 * Cin, Cout)        # K ordered as (kh, kw, cin)
    b2 = b.reshape(1, Cout)

    # Fold batch into the matmul M dimension so the MXU rows stay filled even
    # for P6/P7's tiny spatial extents (M is capped at ~512 rows per step).
    nb = 1
    for d in range(1, N + 1):
        if N % d == 0 and d * Ho * Wo <= 512:
            nb = d
    # Lane-dense Cout chunks; the extra "parallel" axis also lets v7x's two
    # TensorCores split the work even when N == 1 (neutral on v5e/v6e).
    cb = 128 if (Cout % 128 == 0 and Cout > 128) else Cout
    grid = (N // nb, Cout // cb)

    kernel = functools.partial(_conv3x3_s2_kernel, ho=Ho, wo=Wo,
                               relu_input=relu_input,
                               compute_dtype=compute_dtype)
    # Blocks here are small (P6/P7 feature maps are tiny), so the default
    # scoped-VMEM limit is plenty even on v7x's 64 MiB VMEM.
    out = pl.pallas_call(
        kernel,
        out_shape=jax.ShapeDtypeStruct((N, Ho * Wo, Cout), x_nhwc.dtype),
        grid=grid,
        in_specs=[
            pl.BlockSpec((nb, 2, Hh, Wo, 3 * Cin),
                         lambda n, c: (n, 0, 0, 0, 0)),
            pl.BlockSpec((9 * Cin, cb), lambda n, c: (0, c)),
            pl.BlockSpec((1, cb), lambda n, c: (0, c)),
        ],
        out_specs=pl.BlockSpec((nb, Ho * Wo, cb), lambda n, c: (n, 0, c)),
        compiler_params=pltpu.CompilerParams(
            dimension_semantics=("parallel", "parallel")),
    )(xarr, w2, b2)
    return out.reshape(N, Ho, Wo, Cout)


def last_level_p6p7_p5(c5_nchw, p6_params, p7_params, compute_dtype=None):
    """Forward of LastLevelP6P7_P5.  Inputs/outputs are NCHW like PyTorch."""
    (w6, b6), (w7, b7) = p6_params, p7_params            # weights in OIHW
    x = jnp.transpose(c5_nchw, (0, 2, 3, 1))              # NCHW -> NHWC
    w6h = jnp.transpose(w6, (2, 3, 1, 0))                  # OIHW -> HWIO
    w7h = jnp.transpose(w7, (2, 3, 1, 0))
    p6 = conv3x3_s2_p1(x, w6h, b6, relu_input=False, compute_dtype=compute_dtype)
    # ReLU(p6) is fused into the p7 kernel (no separate elementwise pass).
    # Further fusion (keeping p6 in VMEM across both convs) is possible but
    # kept separate here for clarity; p6/p7 maps are tiny so the intermediate
    # HBM round-trip is small.
    p7 = conv3x3_s2_p1(p6, w7h, b7, relu_input=True, compute_dtype=compute_dtype)
    return (jnp.transpose(p6, (0, 3, 1, 2)),
            jnp.transpose(p7, (0, 3, 1, 2)))


def _ref_conv(x_nchw, w_oihw, b):
    y = jax.lax.conv_general_dilated(
        x_nchw, w_oihw, window_strides=(2, 2), padding=((1, 1), (1, 1)),
        dimension_numbers=("NCHW", "OIHW", "NCHW"))
    return y + b[None, :, None, None]


if __name__ == "__main__":
    key = jax.random.PRNGKey(0)
    k_x, k_w6, k_w7 = jax.random.split(key, 3)

    N, Cin, H, W, Cout = 2, 4, 16, 16, 8
    x = jax.random.normal(k_x, (N, Cin, H, W), jnp.float32)

    # c2_xavier_fill: kaiming_uniform(a=1) -> U(-sqrt(3/fan_in), sqrt(3/fan_in)), bias=0
    bound6 = float(np.sqrt(3.0 / (Cin * 9)))
    w6 = jax.random.uniform(k_w6, (Cout, Cin, 3, 3), jnp.float32, -bound6, bound6)
    b6 = jnp.zeros((Cout,), jnp.float32)
    bound7 = float(np.sqrt(3.0 / (Cout * 9)))
    w7 = jax.random.uniform(k_w7, (Cout, Cout, 3, 3), jnp.float32, -bound7, bound7)
    b7 = jnp.zeros((Cout,), jnp.float32)

    # pure-JAX reference (same semantics as the PyTorch module)
    r6 = _ref_conv(x, w6, b6)
    r7 = _ref_conv(jnp.maximum(r6, 0.0), w7, b7)

    # --- f32 path: exact check -------------------------------------------
    p6, p7 = last_level_p6p7_p5(x, (w6, b6), (w7, b7))
    jax.block_until_ready((p6, p7))
    assert p6.shape == (N, Cout, 8, 8) and p7.shape == (N, Cout, 4, 4)
    np.testing.assert_allclose(np.asarray(p6), np.asarray(r6), rtol=1e-4, atol=1e-4)
    np.testing.assert_allclose(np.asarray(p7), np.asarray(r7), rtol=1e-4, atol=1e-4)

    # --- bf16 MXU path (native v6e/v7x throughput), f32 accumulation ------
    p6b, p7b = last_level_p6p7_p5(x, (w6, b6), (w7, b7),
                                  compute_dtype=jnp.bfloat16)
    jax.block_until_ready((p6b, p7b))
    np.testing.assert_allclose(np.asarray(p6b), np.asarray(r6), rtol=5e-2, atol=5e-2)
    np.testing.assert_allclose(np.asarray(p7b), np.asarray(r7), rtol=5e-2, atol=5e-2)

    print("KERNEL_OK")
</pallas_src>

<mosaic_0001>
module attributes {stable_mosaic.version = 11 : i64} {
  func.func @_conv3x3_s2_kernel(%arg0: i32, %arg1: i32, %arg2: memref<2x2x9x8x12xf32, #tpu.memory_space<vmem>>, %arg3: memref<36x8xf32, #tpu.memory_space<vmem>>, %arg4: memref<1x8xf32, #tpu.memory_space<vmem>>, %arg5: memref<2x64x8xf32, #tpu.memory_space<vmem>>) attributes {dimension_semantics = [#tpu.dimension_semantics<parallel>, #tpu.dimension_semantics<parallel>], iteration_bounds = array<i64: 1, 1>, scalar_prefetch = 0 : i64, scratch_operands = 0 : i64, tpu.core_type = #tpu.core_type<tc>, window_params = [{transform_indices = @transform_0, window_bounds = array<i64: 2, 2, 9, 8, 12>}, {transform_indices = @transform_1, window_bounds = array<i64: 36, 8>}, {transform_indices = @transform_2, window_bounds = array<i64: 1, 8>}, {transform_indices = @transform_3, window_bounds = array<i64: 2, 64, 8>}]} {
    %c0 = arith.constant 0 : index
    %c0_0 = arith.constant 0 : index
    %c0_1 = arith.constant 0 : index
    %c0_2 = arith.constant 0 : index
    %c0_3 = arith.constant 0 : index
    %0 = vector.load %arg2[%c0, %c0_0, %c0_1, %c0_2, %c0_3] : memref<2x2x9x8x12xf32, #tpu.memory_space<vmem>>, vector<2x2x9x8x12xf32>
    %1 = vector.extract_strided_slice %0 {offsets = [0, 0, 0, 0, 0], sizes = [2, 1, 8, 8, 12], strides = [1, 1, 1, 1, 1]} : vector<2x2x9x8x12xf32> to vector<2x1x8x8x12xf32>
    %2 = vector.shape_cast %1 : vector<2x1x8x8x12xf32> to vector<2x8x8x12xf32>
    %3 = vector.extract_strided_slice %0 {offsets = [0, 1, 0, 0, 0], sizes = [2, 1, 8, 8, 12], strides = [1, 1, 1, 1, 1]} : vector<2x2x9x8x12xf32> to vector<2x1x8x8x12xf32>
    %4 = vector.shape_cast %3 : vector<2x1x8x8x12xf32> to vector<2x8x8x12xf32>
    %5 = vector.extract_strided_slice %0 {offsets = [0, 0, 1, 0, 0], sizes = [2, 1, 8, 8, 12], strides = [1, 1, 1, 1, 1]} : vector<2x2x9x8x12xf32> to vector<2x1x8x8x12xf32>
    %6 = vector.shape_cast %5 : vector<2x1x8x8x12xf32> to vector<2x8x8x12xf32>
    %7 = tpu.concatenate %2, %4, %6 in 3 : vector<2x8x8x12xf32>, vector<2x8x8x12xf32>, vector<2x8x8x12xf32> -> vector<2x8x8x36xf32>
    %8 = vector.shape_cast %7 : vector<2x8x8x36xf32> to vector<128x36xf32>
    %c0_4 = arith.constant 0 : index
    %c0_5 = arith.constant 0 : index
    %9 = vector.load %arg3[%c0_4, %c0_5] : memref<36x8xf32, #tpu.memory_space<vmem>>, vector<36x8xf32>
    %cst = arith.constant dense<0.000000e+00> : vector<128x8xf32>
    %10 = tpu.matmul %8, %9, %cst {dimension_numbers = #tpu.dot_dimension_numbers<[1], [0], [0], [1], [0, 0, 1, 1], [], []>} : vector<128x36xf32>, vector<36x8xf32>, vector<128x8xf32> -> vector<128x8xf32>
    %c0_6 = arith.constant 0 : index
    %c0_7 = arith.constant 0 : index
    %11 = vector.load %arg4[%c0_6, %c0_7] : memref<1x8xf32, #tpu.memory_space<vmem>>, vector<1x8xf32>
    %12 = vector.broadcast %11 : vector<1x8xf32> to vector<128x8xf32>
    %13 = arith.addf %10, %12 : vector<128x8xf32>
    %14 = vector.shape_cast %13 : vector<128x8xf32> to vector<2x64x8xf32>
    %c0_8 = arith.constant 0 : index
    %c0_9 = arith.constant 0 : index
    %c0_10 = arith.constant 0 : index
    %15 = vector.load %arg5[%c0_8, %c0_9, %c0_10] : memref<2x64x8xf32, #tpu.memory_space<vmem>>, vector<2x64x8xf32>
    tpu.vector_store %arg5[%c0_8, %c0_9, %c0_10], %14 {strides = array<i32>} : memref<2x64x8xf32, #tpu.memory_space<vmem>>, vector<2x64x8xf32>,
    return
  }
  func.func @transform_0(%arg0: i32, %arg1: i32) -> (i32, i32, i32, i32, i32) {
    %c0_i32 = arith.constant 0 : i32
    %c0_i32_0 = arith.constant 0 : i32
    %c0_i32_1 = arith.constant 0 : i32
    %c0_i32_2 = arith.constant 0 : i32
    %c0_i32_3 = arith.constant 0 : i32
    return %arg0, %c0_i32, %c0_i32_0, %c0_i32_1, %c0_i32_2 : i32, i32, i32, i32, i32
  }
  func.func @transform_1(%arg0: i32, %arg1: i32) -> (i32, i32) {
    %c0_i32 = arith.constant 0 : i32
    %c0_i32_0 = arith.constant 0 : i32
    return %c0_i32, %arg1 : i32, i32
  }
  func.func @transform_2(%arg0: i32, %arg1: i32) -> (i32, i32) {
    %c0_i32 = arith.constant 0 : i32
    %c0_i32_0 = arith.constant 0 : i32
    return %c0_i32, %arg1 : i32, i32
  }
  func.func @transform_3(%arg0: i32, %arg1: i32) -> (i32, i32, i32) {
    %c0_i32 = arith.constant 0 : i32
    %c0_i32_0 = arith.constant 0 : i32
    return %arg0, %c0_i32, %arg1 : i32, i32, i32
  }
}

</mosaic_0001>

<bundles_post_ra>
// kernel: tpu_custom_call.1
= control target key start
LH: loop header
LB: loop body
LE: loop exit
PB: predicated region body
PF: predicated region fallthrough
CT: control target
= control target key end

     0   :  { %8 = vsyncpa [#allocation3], 0  ;;  %s572_s12 = smov [#allocation2]   ;;  %s827_s0 = inlined_call_operand.hbm [shape: f32[2,2,9,8,12], index: 0, kind: input, shape index: {}]   ;;  %s828_s1 = inlined_call_operand.vmem [shape: f32[36,8], index: 1, kind: input, shape index: {}]   ;;  %s829_s2 = inlined_call_operand.vmem [shape: f32[1,8], index: 2, kind: input, shape index: {}]   ;;  %s830_s3 = inlined_call_operand.vmem [shape: f32[2,64,8], index: 3, kind: output, shape index: {}]  }
   0x1   :  { %s14_s13 = sshll.u32 %s572_s12, 4  ;;  %s548_s16 = scalar_lea.hbm %s827_s0, 4608  ;;  %s15_s13 = int_to_ptr.vmem [resolvable:$true] %s14_s13 }
   0x2   :  { %p549_p0 = scmp.ne.s32.totalorder %s827_s0, %s548_s16  ;;  %p552_p1 = scmp.lt.u32.totalorder %s548_s16, %s827_s0 }
   0x4   :  { %p554_p2 = pnand %p552_p1, %p549_p0 }
   0x6   :  { %557 = shalt.err (!%p554_p2)
}
   0x7   :  { %s558_s21 = scalar_lea.vmem %s15_s13, 4608  ;;  %p563_p4 = scmp.lt.s32.totalorder %s15_s13, %s15_s13 }
   0x8   :  { %p559_p3 = scmp.ne.s32.totalorder %s15_s13, %s558_s21  ;;  %p564_p5 = scmp.lt.s32.totalorder %s558_s21, %s558_s21 }
   0xa   :  { %p565_p6 = por %p564_p5, %p563_p4 }
   0xc   :  { %p566_p7 = pnand %p565_p6, %p559_p3 }
   0xe   :  { %569 = shalt.err (!%p566_p7)
}
   0xf   :  { %s573_s22 = smov 128   ;;  %s574_s23 = smov 8  }
  0x10   :  { %20 = dma.hbm_to_vmem [thread:$0]  %s827_s0, 4608, %s15_s13, [#allocation3], %s573_s22, %s573_s22, %s574_s23  }
  0x11   :  { %570 = dma.done.wait [#allocation3], 4608  }
  0x12   :  { %571 = vsyncadd [#allocation3], 4294962688  ;;  %v38_v0 = vld [vmem:[#allocation2 + $0x50] sm:$0xff]  ;;  %v37_v1 = vld [vmem:[#allocation2 + $0x48] sm:$0xff]  ;;  %s575_s26 = smov 12   ;;  %s576_s0 = smov 24  }
  0x13   :  { %80 = vrot.lane.b32.xlu1 %v38_v0, %s575_s26  ;;  %78 = vrot.lane.b32.xlu0 %v37_v1, %s575_s26  ;;  %v55_v2 = vld [vmem:[#allocation2 + $0xe0] sm:$0xff]  ;;  %v54_v3 = vld [vmem:[#allocation2 + $0xd8] sm:$0xff]  ;;  %v615_v5 = vld [vmem:[#allocation2 + $0x8] sm:$0xff]  ;;  %vm285_vm0 = vcmask 1043456   ;;  %vm190_vm1 = vcmask 97280   ;;  %vm207_vm2 = vcmask 195584  }
  0x14   :  { %v613_v4 = vld [vmem:[#allocation2 + $0x98] sm:$0xff]  ;;  %v621_v6 = vld [vmem:[#allocation2 + $0xa0] sm:$0xff]  ;;  %v623_v7 = vld [vmem:[#allocation2 + $0x10] sm:$0xff]  ;;  %vm236_vm3 = vcmask 293888   ;;  %vm434_vm4 = vcmask 64512  }
  0x15   :  { %v224_v8 = vld [vmem:[%s828_s1] sm:$0xff]  ;;  %v225_v9 = vld [vmem:[%s828_s1 + $0x8] sm:$0xff]  ;;  %v226_v11 = vld [vmem:[%s828_s1 + $0x10] sm:$0xff] }
  0x16   :  { %v529_v10 = vpack.c.bf16 %v225_v9, %v224_v8  ;;  %v227_v12 = vld [vmem:[%s828_s1 + $0x18] sm:$0xff]  ;;  %v56_v14 = vld [vmem:[#allocation2 + $0xe8] sm:$0xff]  ;;  %v228_v16 = vld [vmem:[%s828_s1 + $0x20] sm:$0xf] }
  0x17   :  { %96 = vrot.lane.b32.xlu1 %v55_v2, %s575_s26  ;;  %94 = vrot.lane.b32.xlu0 %v54_v3, %s575_s26  ;;  %v533_v13 = vpack.c.bf16 %v227_v12, %v226_v11  ;;  %v39_v15 = vld [vmem:[#allocation2 + $0x58] sm:$0xff]  ;;  %v57_v17 = vld [vmem:[#allocation2 + $0xf0] sm:$0xff]  ;;  %v40_v18 = vld [vmem:[#allocation2 + $0x60] sm:$0xff] }
  0x18   :  { %530 = vmatprep.subr.bf16.mxu0 %v529_v10  ;;  %537 = vmatprep.subr.bf16.mxu1 %v529_v10  ;;  %v648_v19 = vld [vmem:[#allocation2 + $0xa8] sm:$0xff]  ;;  %v650_v20 = vld [vmem:[#allocation2 + $0x18] sm:$0xff]  ;;  %v656_v21 = vld [vmem:[#allocation2 + $0xb0] sm:$0xff] }
  0x19   :  { %532 = vmatpush3.bf16.msra.mxu0 %v529_v10  ;;  %540 = vmatpush3.bf16.msra.mxu1 %v529_v10  ;;  %v658_v22 = vld [vmem:[#allocation2 + $0x20] sm:$0xff]  ;;  %v58_v23 = vld [vmem:[#allocation2 + $0xf8] sm:$0xff]  ;;  %v41_v24 = vld [vmem:[#allocation2 + $0x68] sm:$0xff] }
  0x1a   :  { %534 = vmatprep.subr.bf16.mxu0 %v533_v13  ;;  %538 = vmatprep.subr.bf16.mxu1 %v533_v13  ;;  %v59_v25 = vld [vmem:[#allocation2 + $0x100] sm:$0xff]  ;;  %v42_v26 = vld [vmem:[#allocation2 + $0x70] sm:$0xff]  ;;  %v668_v27 = vld [vmem:[#allocation2 + $0xb8] sm:$0xff] }
  0x1b   :  { %158 = vrot.lane.b32.xlu1 %v613_v4, %s576_s0  ;;  %142 = vrot.lane.b32.xlu0 %v615_v5, %s576_s0  ;;  %v670_v28 = vld [vmem:[#allocation2 + $0x28] sm:$0xff]  ;;  %v676_v29 = vld [vmem:[#allocation2 + $0xc0] sm:$0xff]  ;;  %v678_v30 = vld [vmem:[#allocation2 + $0x30] sm:$0xff] }
  0x1c   :  { %v60_v31 = vld [vmem:[#allocation2 + $0x108] sm:$0xff]  ;;  %v43_v32 = vld [vmem:[#allocation2 + $0x78] sm:$0xff]  ;;  %v61_v33 = vld [vmem:[#allocation2 + $0x110] sm:$0xff] }
  0x1d   :  { %536 = vmatpush3.bf16.msra.mxu0 %v533_v13  ;;  %541 = vmatpush3.bf16.msra.mxu1 %v533_v13  ;;  %v44_v34 = vld [vmem:[#allocation2 + $0x80] sm:$0xff]  ;;  %v688_v35 = vld [vmem:[#allocation2 + $0xc8] sm:$0xff]  ;;  %v690_v36 = vld [vmem:[#allocation2 + $0x38] sm:$0xff] }
  0x1e   :  { %503 = vmatprep.subr.msk.mxu0 %vm285_vm0, %v228_v16  ;;  %539 = vmatprep.subr.msk.mxu1 %vm285_vm0, %v228_v16  ;;  %v53_v37 = vld [vmem:[#allocation2 + $0xd0] sm:$0xff]  ;;  %v36_v38 = vld [vmem:[#allocation2 + $0x40] sm:$0xff] }
  0x1f   :  { %160 = vrot.lane.b32.xlu1 %v621_v6, %s576_s0  ;;  %144 = vrot.lane.b32.xlu0 %v623_v7, %s576_s0  ;;  %v28_v43 = vld [vmem:[#allocation2] sm:$0xff]  ;;  %v45_v44 = vld [vmem:[#allocation2 + $0x90] sm:$0xff] }
  0x21   :  { %504 = vmatpush3.msk.msra.mxu0 %vm285_vm0, %v228_v16  ;;  %542 = vmatpush3.msk.msra.mxu1 %vm285_vm0, %v228_v16 }
  0x23   :  { %98 = vrot.lane.b32.xlu1 %v56_v14, %s575_s26  ;;  %82 = vrot.lane.b32.xlu0 %v39_v15, %s575_s26 }
  0x27   :  { %100 = vrot.lane.b32.xlu1 %v57_v17, %s575_s26  ;;  %84 = vrot.lane.b32.xlu0 %v40_v18, %s575_s26 }
  0x2b   :  { %162 = vrot.lane.b32.xlu1 %v648_v19, %s576_s0  ;;  %146 = vrot.lane.b32.xlu0 %v650_v20, %s576_s0 }
  0x2f   :  { %164 = vrot.lane.b32.xlu1 %v656_v21, %s576_s0  ;;  %148 = vrot.lane.b32.xlu0 %v658_v22, %s576_s0 }
  0x33   :  { %102 = vrot.lane.b32.xlu1 %v58_v23, %s575_s26  ;;  %86 = vrot.lane.b32.xlu0 %v41_v24, %s575_s26 }
  0x37   :  { %104 = vrot.lane.b32.xlu1 %v59_v25, %s575_s26  ;;  %88 = vrot.lane.b32.xlu0 %v42_v26, %s575_s26 }
  0x3b   :  { %166 = vrot.lane.b32.xlu1 %v668_v27, %s576_s0  ;;  %150 = vrot.lane.b32.xlu0 %v670_v28, %s576_s0 }
  0x3f   :  { %168 = vrot.lane.b32.xlu1 %v676_v29, %s576_s0  ;;  %152 = vrot.lane.b32.xlu0 %v678_v30, %s576_s0 }
  0x43   :  { %106 = vrot.lane.b32.xlu1 %v60_v31, %s575_s26  ;;  %90 = vrot.lane.b32.xlu0 %v43_v32, %s575_s26 }
  0x47   :  { %108 = vrot.lane.b32.xlu1 %v61_v33, %s575_s26  ;;  %92 = vrot.lane.b32.xlu0 %v44_v34, %s575_s26 }
  0x4b   :  { %170 = vrot.lane.b32.xlu1 %v688_v35, %s576_s0  ;;  %154 = vrot.lane.b32.xlu0 %v690_v36, %s576_s0 }
  0x4f   :  { %172 = vrot.lane.b32.xlu1 %v53_v37, %s576_s0  ;;  %156 = vrot.lane.b32.xlu0 %v36_v38, %s576_s0 }
  0x85   :  { %v81_v39 = vpop.permute.xlu1 %80  ;;  %v79_v40 = vpop.permute.xlu0 %78 }
  0x86   :  { %v191_v45 = vsel %vm190_vm1, %v28_v43, %v79_v40  ;;  %v192_v51 = vsel %vm190_vm1, %v615_v5, %v81_v39  ;;  %v456_v43 = vld [vmem:[%s829_s2] ss:$0 sm:$0xff] }
  0x89   :  { %v97_v41 = vpop.permute.xlu1 %96  ;;  %v95_v42 = vpop.permute.xlu0 %94 }
  0x8a   :  { %v199_v46 = vsel %vm190_vm1, %v45_v44, %v95_v42  ;;  %v200_v52 = vsel %vm190_vm1, %v613_v4, %v97_v41 }
  0x8d   :  { %v159_v47 = vpop.permute.xlu1 %158  ;;  %v143_v48 = vpop.permute.xlu0 %142 }
  0x8e   :  { %v208_v49 = vsel %vm207_vm2, %v191_v45, %v143_v48  ;;  %v216_v50 = vsel %vm207_vm2, %v199_v46, %v159_v47 }
  0x8f   :  { %505 = vmatprep.mubr.msk.f32.mxu0 %vm236_vm3, %v208_v49  ;;  %517 = vmatprep.mubr.msk.f32.mxu1 %vm236_vm3, %v216_v50 }
  0x91   :  { %v161_v53 = vpop.permute.xlu1 %160  ;;  %v145_v54 = vpop.permute.xlu0 %144 }
  0x92   :  { %v217_v55 = vsel %vm207_vm2, %v200_v52, %v161_v53  ;;  %v209_v56 = vsel %vm207_vm2, %v192_v51, %v145_v54 }
  0x93   :  { %506 = vmatmul.mubr.msk.f32.vlgmr.msra.gmra.mrb[0].mxu0 %vm236_vm3, %v209_v56  ;;  %518 = vmatmul.mubr.msk.f32.vlgmr.msra.gmra.mrb[0].mxu1 %vm236_vm3, %v217_v55 }
  0x95   :  { %v99_v57 = vpop.permute.xlu1 %98  ;;  %v83_v58 = vpop.permute.xlu0 %82 }
  0x96   :  { %v201_v61 = vsel %vm190_vm1, %v621_v6, %v99_v57  ;;  %v193_v62 = vsel %vm190_vm1, %v623_v7, %v83_v58 }
  0x99   :  { %v101_v59 = vpop.permute.xlu1 %100  ;;  %v85_v60 = vpop.permute.xlu0 %84 }
  0x9a   :  { %v202_v3 = vsel %vm190_vm1, %v648_v19, %v101_v59  ;;  %v194_v4 = vsel %vm190_vm1, %v650_v20, %v85_v60 }
  0x9d   :  { %v163_v63 = vpop.permute.xlu1 %162  ;;  %v147_v0 = vpop.permute.xlu0 %146 }
  0x9e   :  { %v218_v1 = vsel %vm207_vm2, %v201_v61, %v163_v63  ;;  %v210_v2 = vsel %vm207_vm2, %v193_v62, %v147_v0 }
  0x9f   :  { %508 = vmatprep.mubr.msk.f32.mxu0 %vm236_vm3, %v210_v2  ;;  %520 = vmatprep.mubr.msk.f32.mxu1 %vm236_vm3, %v218_v1 }
  0xa1   :  { %v165_v5 = vpop.permute.xlu1 %164  ;;  %v149_v6 = vpop.permute.xlu0 %148 }
  0xa2   :  { %v219_v7 = vsel %vm207_vm2, %v202_v3, %v165_v5  ;;  %v211_v8 = vsel %vm207_vm2, %v194_v4, %v149_v6 }
  0xa3   :  { %509 = vmatmul.mubr.msk.f32.gmra.mrb[2].mxu0 %vm236_vm3, %v211_v8  ;;  %521 = vmatmul.mubr.msk.f32.gmra.mrb[2].mxu1 %vm236_vm3, %v219_v7 }
  0xa5   :  { %v103_v9 = vpop.permute.xlu1 %102  ;;  %v87_v10 = vpop.permute.xlu0 %86 }
  0xa6   :  { %v203_v13 = vsel %vm190_vm1, %v656_v21, %v103_v9  ;;  %v195_v14 = vsel %vm190_vm1, %v658_v22, %v87_v10 }
  0xa9   :  { %v105_v11 = vpop.permute.xlu1 %104  ;;  %v89_v12 = vpop.permute.xlu0 %88 }
  0xaa   :  { %v204_v19 = vsel %vm190_vm1, %v668_v27, %v105_v11  ;;  %v196_v20 = vsel %vm190_vm1, %v670_v28, %v89_v12 }
  0xad   :  { %v167_v15 = vpop.permute.xlu1 %166  ;;  %v151_v16 = vpop.permute.xlu0 %150 }
  0xae   :  { %v220_v17 = vsel %vm207_vm2, %v203_v13, %v167_v15  ;;  %v212_v18 = vsel %vm207_vm2, %v195_v14, %v151_v16 }
  0xaf   :  { %511 = vmatprep.mubr.msk.f32.mxu0 %vm236_vm3, %v212_v18  ;;  %523 = vmatprep.mubr.msk.f32.mxu1 %vm236_vm3, %v220_v17 }
  0xb1   :  { %v169_v21 = vpop.permute.xlu1 %168  ;;  %v153_v23 = vpop.permute.xlu0 %152 }
  0xb2   :  { %v221_v22 = vsel %vm207_vm2, %v204_v19, %v169_v21  ;;  %v213_v24 = vsel %vm207_vm2, %v196_v20, %v153_v23 }
  0xb3   :  { %512 = vmatmul.mubr.msk.f32.gmra.mrb[4].mxu0 %vm236_vm3, %v213_v24  ;;  %524 = vmatmul.mubr.msk.f32.gmra.mrb[4].mxu1 %vm236_vm3, %v221_v22 }
  0xb5   :  { %v107_v25 = vpop.permute.xlu1 %106  ;;  %v91_v26 = vpop.permute.xlu0 %90 }
  0xb6   :  { %v205_v27 = vsel %vm190_vm1, %v676_v29, %v107_v25  ;;  %v197_v28 = vsel %vm190_vm1, %v678_v30, %v91_v26 }
  0xb9   :  { %v109_v31 = vpop.permute.xlu1 %108  ;;  %v93_v32 = vpop.permute.xlu0 %92 }
  0xba   :  { %v206_v39 = vsel %vm190_vm1, %v688_v35, %v109_v31  ;;  %v198_v40 = vsel %vm190_vm1, %v690_v36, %v93_v32 }
  0xbd   :  { %v171_v33 = vpop.permute.xlu1 %170  ;;  %v155_v34 = vpop.permute.xlu0 %154 }
  0xbe   :  { %v222_v37 = vsel %vm207_vm2, %v205_v27, %v171_v33  ;;  %v214_v38 = vsel %vm207_vm2, %v197_v28, %v155_v34 }
  0xbf   :  { %514 = vmatprep.mubr.msk.f32.mxu0 %vm236_vm3, %v214_v38  ;;  %526 = vmatprep.mubr.msk.f32.mxu1 %vm236_vm3, %v222_v37 }
  0xc1   :  { %v173_v29 = vpop.permute.xlu1 %172  ;;  %v157_v41 = vpop.permute.xlu0 %156 }
  0xc2   :  { %v223_v30 = vsel %vm207_vm2, %v206_v39, %v173_v29  ;;  %v215_v42 = vsel %vm207_vm2, %v198_v40, %v157_v41 }
  0xc3   :  { %515 = vmatmul.mubr.msk.f32.gmra.mrb[6].mxu0 %vm236_vm3, %v215_v42  ;;  %527 = vmatmul.mubr.msk.f32.gmra.mrb[6].mxu1 %vm236_vm3, %v223_v30 }
 0x166   :  { %v507_v44 = vpop.f32.mrb[0].mxu0  ;;  %v519_v35 = vpop.f32.mrb[0].mxu1 }
 0x167   :  { %v361_v45 = vadd.f32 %v507_v44, %v456_v43  ;;  %v401_v46 = vadd.f32 %v519_v35, %v456_v43  ;;  %v355_v36 = vpop.f32.mrb[1].mxu0  ;;  %v395_v47 = vpop.f32.mrb[1].mxu1 }
 0x168   :  { %v356_v48 = vadd.f32 %v456_v43, %v355_v36  ;;  %v396_v49 = vadd.f32 %v456_v43, %v395_v47 }
 0x169   :  { %436 = vst.msk [vmem:[%s830_s3 + $0x8] sm:$0xff] %vm434_vm4, %v361_v45  ;;  %444 = vst.msk [vmem:[%s830_s3 + $0x48] sm:$0xff] %vm434_vm4, %v401_v46 }
 0x16a   :  { %435 = vst.msk [vmem:[%s830_s3] sm:$0xff] %vm434_vm4, %v356_v48  ;;  %443 = vst.msk [vmem:[%s830_s3 + $0x40] sm:$0xff] %vm434_vm4, %v396_v49 }
 0x176   :  { %v510_v50 = vpop.f32.mrb[2].mxu0  ;;  %v522_v51 = vpop.f32.mrb[2].mxu1 }
 0x177   :  { %v371_v52 = vadd.f32 %v510_v50, %v456_v43  ;;  %v411_v53 = vadd.f32 %v522_v51, %v456_v43  ;;  %v365_v54 = vpop.f32.mrb[3].mxu0  ;;  %v405_v55 = vpop.f32.mrb[3].mxu1 }
 0x178   :  { %v366_v56 = vadd.f32 %v456_v43, %v365_v54  ;;  %v406_v57 = vadd.f32 %v456_v43, %v405_v55 }
 0x179   :  { %438 = vst.msk [vmem:[%s830_s3 + $0x18] sm:$0xff] %vm434_vm4, %v371_v52  ;;  %446 = vst.msk [vmem:[%s830_s3 + $0x58] sm:$0xff] %vm434_vm4, %v411_v53 }
 0x17a   :  { %437 = vst.msk [vmem:[%s830_s3 + $0x10] sm:$0xff] %vm434_vm4, %v366_v56  ;;  %445 = vst.msk [vmem:[%s830_s3 + $0x50] sm:$0xff] %vm434_vm4, %v406_v57 }
 0x186   :  { %v513_v58 = vpop.f32.mrb[4].mxu0  ;;  %v525_v59 = vpop.f32.mrb[4].mxu1 }
 0x187   :  { %v381_v60 = vadd.f32 %v513_v58, %v456_v43  ;;  %v421_v61 = vadd.f32 %v525_v59, %v456_v43  ;;  %v375_v62 = vpop.f32.mrb[5].mxu0  ;;  %v415_v63 = vpop.f32.mrb[5].mxu1 }
 0x188   :  { %v376_v0 = vadd.f32 %v456_v43, %v375_v62  ;;  %v416_v1 = vadd.f32 %v456_v43, %v415_v63 }
 0x189   :  { %440 = vst.msk [vmem:[%s830_s3 + $0x28] sm:$0xff] %vm434_vm4, %v381_v60  ;;  %448 = vst.msk [vmem:[%s830_s3 + $0x68] sm:$0xff] %vm434_vm4, %v421_v61 }
 0x18a   :  { %439 = vst.msk [vmem:[%s830_s3 + $0x20] sm:$0xff] %vm434_vm4, %v376_v0  ;;  %447 = vst.msk [vmem:[%s830_s3 + $0x60] sm:$0xff] %vm434_vm4, %v416_v1 }
 0x196   :  { %v516_v2 = vpop.f32.mrb[6].mxu0  ;;  %v528_v3 = vpop.f32.mrb[6].mxu1 }
 0x197   :  { %v391_v4 = vadd.f32 %v516_v2, %v456_v43  ;;  %v431_v5 = vadd.f32 %v528_v3, %v456_v43  ;;  %v385_v6 = vpop.f32.mrb[7].mxu0  ;;  %v425_v7 = vpop.f32.mrb[7].mxu1 }
 0x198   :  { %v386_v8 = vadd.f32 %v456_v43, %v385_v6  ;;  %v426_v9 = vadd.f32 %v456_v43, %v425_v7 }
 0x199   :  { %442 = vst.msk [vmem:[%s830_s3 + $0x38] sm:$0xff] %vm434_vm4, %v391_v4  ;;  %450 = vst.msk [vmem:[%s830_s3 + $0x78] sm:$0xff] %vm434_vm4, %v431_v5 }
 0x19a   :  { %441 = vst.msk [vmem:[%s830_s3 + $0x30] sm:$0xff] %vm434_vm4, %v386_v8  ;;  %449 = vst.msk [vmem:[%s830_s3 + $0x70] sm:$0xff] %vm434_vm4, %v426_v9 }
 0x19b   :  { %455 = vsyncpa [#allocation3], 1 }

</bundles_post_ra>
